<compile_context>
chip_gen: v5e
topology: v5e:2x2
jax: 0.10.0
libtpu: 0.0.40
codegen_flags: <defaults>
</compile_context>

<pallas_src>
import jax
import jax.numpy as jnp
import numpy as np
from jax.experimental import pallas as pl
from jax.experimental.pallas import tpu as pltpu


_DEFAULT_MAX_LANE_TILE = 2048  # rows per grid step on the lane axis (mult. of 128)


def _round_up(n, m):
    return ((n + m - 1) // m) * m


def _lane_tiling(rows, max_tile):
    """Pick a lane tile (multiple of 128, <= max_tile) and the padded row count."""
    max_tile = max(128, (max_tile // 128) * 128)
    tile = min(max(128, _round_up(rows, 128)), max_tile)
    rows_pad = _round_up(rows, tile)
    return tile, rows_pad


# -----------------------------------------------------------------------------
# Pallas kernels
# -----------------------------------------------------------------------------
def _weighted_ce_kernel(logits_ref, tgt_ref, w_ref, out_ref, num_acc, den_acc):
    """Weighted softmax cross entropy, PyTorch 'mean' semantics:
         sum_i w[t_i] * nll_i / sum_i w[t_i]

    logits_ref : [K, TR]  classes on sublanes, rows on lanes
    tgt_ref    : [1, TR]  int32 target class per row
    w_ref      : [1, TR]  f32 per-row class weight (0 on padded rows)
    """
    i = pl.program_id(0)

    @pl.when(i == 0)
    def _init():
        num_acc[...] = jnp.zeros_like(num_acc)
        den_acc[...] = jnp.zeros_like(den_acc)

    x = logits_ref[...].astype(jnp.float32)               # [K, TR]
    t = tgt_ref[...]                                      # [1, TR] int32
    w = w_ref[...].astype(jnp.float32)                    # [1, TR]

    m = jnp.max(x, axis=0, keepdims=True)                 # [1, TR]
    lse = m + jnp.log(jnp.sum(jnp.exp(x - m), axis=0, keepdims=True))

    cls = jax.lax.broadcasted_iota(jnp.int32, x.shape, 0)  # [K, TR]
    onehot = (cls == t).astype(jnp.float32)                # [K, TR]
    logit_t = jnp.sum(x * onehot, axis=0, keepdims=True)   # [1, TR]
    nll = (lse - logit_t) * w                              # [1, TR]

    num_acc[...] += jnp.sum(nll, axis=(0, 1), keepdims=True)
    den_acc[...] += jnp.sum(w, axis=(0, 1), keepdims=True)

    @pl.when(i == pl.num_programs(0) - 1)
    def _finalize():
        out_ref[...] = num_acc[...] * pl.reciprocal(den_acc[...], approx=False)


def _dfl_cost_kernel(dist_ref, txy_ref, cn_ref, out_ref, num_acc, den_acc):
    """Distribution focal loss weighted by normalized matching cost.

    dist_ref : [nb, TR]  bin logits, bins on sublanes, coord-rows on lanes
    txy_ref  : [1, TR]   clipped target offset (tp - anchor + reg_max)
    cn_ref   : [1, TR]   normalized cost weight (0 on padded rows)
    Result   : sum_r dfl_r * cn_r / sum_r cn_r  (== torch sum(dfl*cost)/cost.sum())
    """
    i = pl.program_id(0)

    @pl.when(i == 0)
    def _init():
        num_acc[...] = jnp.zeros_like(num_acc)
        den_acc[...] = jnp.zeros_like(den_acc)

    x = dist_ref[...].astype(jnp.float32)                  # [nb, TR]
    txy = txy_ref[...].astype(jnp.float32)                 # [1, TR]
    cn = cn_ref[...].astype(jnp.float32)                   # [1, TR]

    tl = txy.astype(jnp.int32)                             # floor (txy >= 0)
    wl = (tl.astype(jnp.float32) + 1.0) - txy
    wr = 1.0 - wl

    m = jnp.max(x, axis=0, keepdims=True)
    lse = m + jnp.log(jnp.sum(jnp.exp(x - m), axis=0, keepdims=True))  # [1, TR]

    bins = jax.lax.broadcasted_iota(jnp.int32, x.shape, 0)  # [nb, TR]
    oh_l = (bins == tl).astype(jnp.float32)
    oh_r = (bins == (tl + 1)).astype(jnp.float32)
    ce_l = lse - jnp.sum(x * oh_l, axis=0, keepdims=True)
    ce_r = lse - jnp.sum(x * oh_r, axis=0, keepdims=True)
    row = ce_l * wl + ce_r * wr                             # [1, TR]

    num_acc[...] += jnp.sum(row * cn, axis=(0, 1), keepdims=True)
    den_acc[...] += jnp.sum(cn, axis=(0, 1), keepdims=True)

    @pl.when(i == pl.num_programs(0) - 1)
    def _finalize():
        out_ref[...] = num_acc[...] * pl.reciprocal(den_acc[...], approx=False)


# -----------------------------------------------------------------------------
# pallas_call wrappers (row-tiled grid, lane padding)
# -----------------------------------------------------------------------------
def _scalar_reduce_call(kernel, mats, rows_specs_tile, grid):
    """Common pallas_call plumbing for the two scalar-reduction kernels."""
    in_specs = []
    for a in mats:
        d0 = a.shape[0]
        in_specs.append(pl.BlockSpec((d0, rows_specs_tile), lambda i: (0, i)))
    return pl.pallas_call(
        kernel,
        out_shape=jax.ShapeDtypeStruct((1, 1), jnp.float32),
        grid_spec=pltpu.PrefetchScalarGridSpec(
            num_scalar_prefetch=0,
            grid=grid,
            in_specs=in_specs,
            out_specs=pl.BlockSpec((1, 1), lambda i: (0, 0)),
            scratch_shapes=[pltpu.VMEM((1, 1), jnp.float32),
                            pltpu.VMEM((1, 1), jnp.float32)],
        ),
        compiler_params=pltpu.CompilerParams(
            dimension_semantics=("arbitrary",),
            vmem_limit_bytes=32 * 1024 * 1024),
    )(*mats)


def weighted_ce(logits_t, tgt_row, w_row, *, max_lane_tile=_DEFAULT_MAX_LANE_TILE):
    K, R = logits_t.shape
    tile, Rp = _lane_tiling(R, max_lane_tile)
    if Rp != R:
        pad = ((0, 0), (0, Rp - R))
        logits_t = jnp.pad(logits_t, pad)
        tgt_row = jnp.pad(tgt_row, pad)
        w_row = jnp.pad(w_row, pad)        # zero weight -> padded rows ignored
    grid = (Rp // tile,)
    return _scalar_reduce_call(_weighted_ce_kernel,
                               (logits_t, tgt_row, w_row), tile, grid)


def dfl_cost_loss(dist_t, txy_row, cn_row, *, max_lane_tile=_DEFAULT_MAX_LANE_TILE):
    nb, R = dist_t.shape
    tile, Rp = _lane_tiling(R, max_lane_tile)
    if Rp != R:
        pad = ((0, 0), (0, Rp - R))
        dist_t = jnp.pad(dist_t, pad)
        txy_row = jnp.pad(txy_row, pad)
        cn_row = jnp.pad(cn_row, pad)      # zero cost weight -> padded rows ignored
    grid = (Rp // tile,)
    return _scalar_reduce_call(_dfl_cost_kernel,
                               (dist_t, txy_row, cn_row), tile, grid)


# -----------------------------------------------------------------------------
# SetCriterion_Crowd equivalent (glue in plain JAX, hot paths in Pallas)
# -----------------------------------------------------------------------------
class SetCriterionCrowdPallas:
    def __init__(self, num_classes, matcher, weight_dict, eos_coef, reg_max,
                 losses, max_lane_tile=_DEFAULT_MAX_LANE_TILE):
        self.num_classes = num_classes
        self.reg_max = reg_max
        self.matcher = matcher
        self.weight_dict = weight_dict
        self.eos_coef = eos_coef
        self.losses = losses
        self.max_lane_tile = max_lane_tile
        w = jnp.ones((num_classes + 1,), jnp.float32)
        self.empty_weight = w.at[0].set(eos_coef)

    def forward(self, outputs, targets):
        pred_dist = outputs['pred_dist']
        b, c, a = pred_dist.shape
        # view(b, 2*reg_max+1, 2, a//2).permute(0, 3, 2, 1)
        pd = jnp.transpose(
            pred_dist.reshape(b, 2 * self.reg_max + 1, 2, a // 2), (0, 3, 2, 1))
        output1 = {'pred_logits': outputs['pred_logits'],
                   'pred_points': outputs['pred_points'],
                   'pred_dist': pd,
                   'anchor_points': outputs['anchor_points']}

        indices, cost = self.matcher(output1, targets)
        # TODO(synk): distributed all_reduce of num_points / world-size scaling is
        # unused by these two losses and omitted here.

        batch_idx = jnp.concatenate(
            [jnp.full_like(src, i) for i, (src, _) in enumerate(indices)])
        src_idx = jnp.concatenate([src for src, _ in indices])

        losses = {}
        if 'labels' in self.losses:
            tco = jnp.concatenate(
                [t['labels'][J] for t, (_, J) in zip(targets, indices)])
            B, N, K = output1['pred_logits'].shape
            target_classes = jnp.zeros((B, N), jnp.int32)
            target_classes = target_classes.at[batch_idx, src_idx].set(tco)
            R = B * N
            # Lane-dense: classes on the (small) sublane axis, rows on lanes.
            logits_t = output1['pred_logits'].reshape(R, K).astype(jnp.float32).T
            tgt_row = target_classes.reshape(1, R).astype(jnp.int32)
            # Per-row class weight computed here so the weight vector never enters
            # the kernel; padded rows (added in the wrapper) get weight 0.
            w_row = self.empty_weight[target_classes].reshape(1, R).astype(jnp.float32)
            losses['loss_ce'] = weighted_ce(
                logits_t, tgt_row, w_row, max_lane_tile=self.max_lane_tile)[0, 0]

        if 'points' in self.losses:
            tp = jnp.concatenate(
                [t['point'][J] for t, (_, J) in zip(targets, indices)], axis=0)  # [M,2]
            anc = output1['anchor_points'][batch_idx, src_idx]                   # [M,2]
            sd = output1['pred_dist'][batch_idx, src_idx]                        # [M,2,nb]
            M = tp.shape[0]
            nb = 2 * self.reg_max + 1
            cost_diag = cost[batch_idx, src_idx, jnp.arange(M)]                  # [M]

            # Cost normalization hoisted out of the kernel (scalar min/max in XLA).
            cmin = jnp.min(cost_diag)
            cmax = jnp.max(cost_diag)
            denom = jnp.maximum(cmax - cmin, 1e-12)   # clamp: avoid NaN if all equal
            cn = 1.0 - (cost_diag - cmin) / denom + 0.1                          # [M]

            txy = jnp.clip(tp - anc + self.reg_max, 0.0, 2.0 * self.reg_max - 0.01)
            R2 = 2 * M
            # Lane-dense: bins on sublanes, (match, coord) rows on lanes.
            dist_t = sd.reshape(R2, nb).astype(jnp.float32).T                    # [nb, 2M]
            txy_row = txy.reshape(1, R2).astype(jnp.float32)
            cn_row = jnp.repeat(cn, 2).reshape(1, R2).astype(jnp.float32)
            losses['loss_points'] = dfl_cost_loss(
                dist_t, txy_row, cn_row, max_lane_tile=self.max_lane_tile)[0, 0]
        return losses


# -----------------------------------------------------------------------------
# Deterministic matcher + pure-JAX reference for validation
# -----------------------------------------------------------------------------
def simple_matcher(output1, targets):
    # TODO(synk): Hungarian assignment (scipy linear_sum_assignment) has no Pallas
    # equivalent; this deterministic matcher assigns target j -> proposal j.
    all_pts = jnp.concatenate([t['point'] for t in targets], axis=0)      # [Mtot,2]
    pp = output1['pred_points']                                            # [B,N,2]
    # MXU-friendly pairwise distance: ||p-t||^2 = |p|^2 + |t|^2 - 2 p.t
    pp2 = jnp.sum(pp * pp, axis=-1, keepdims=True)                         # [B,N,1]
    tt2 = jnp.sum(all_pts * all_pts, axis=-1)                              # [Mtot]
    dots = jnp.einsum('bnd,md->bnm', pp, all_pts,
                      preferred_element_type=jnp.float32)                  # [B,N,Mtot]
    sq = jnp.maximum(pp2 + tt2[None, None, :] - 2.0 * dots, 0.0)
    cost = jnp.sqrt(sq)
    indices = [(jnp.arange(t['point'].shape[0], dtype=jnp.int32),
                jnp.arange(t['point'].shape[0], dtype=jnp.int32)) for t in targets]
    return indices, cost


def ref_forward(outputs, targets, crit):
    rm = crit.reg_max
    b, c, a = outputs['pred_dist'].shape
    pd = jnp.transpose(outputs['pred_dist'].reshape(b, 2 * rm + 1, 2, a // 2),
                       (0, 3, 2, 1))
    o1 = dict(outputs, pred_dist=pd)
    indices, cost = crit.matcher(o1, targets)
    batch_idx = jnp.concatenate([jnp.full_like(s, i) for i, (s, _) in enumerate(indices)])
    src_idx = jnp.concatenate([s for s, _ in indices])

    tco = jnp.concatenate([t['labels'][J] for t, (_, J) in zip(targets, indices)])
    tc = jnp.zeros(outputs['pred_logits'].shape[:2], jnp.int32)
    tc = tc.at[batch_idx, src_idx].set(tco)
    logp = jax.nn.log_softmax(outputs['pred_logits'], axis=-1)
    nll = -jnp.take_along_axis(logp, tc[..., None], axis=-1)[..., 0]
    w = crit.empty_weight[tc]
    loss_ce = jnp.sum(nll * w) / jnp.sum(w)

    tp = jnp.concatenate([t['point'][J] for t, (_, J) in zip(targets, indices)], axis=0)
    anc = o1['anchor_points'][batch_idx, src_idx]
    sd = pd[batch_idx, src_idx]
    M = tp.shape[0]
    cdiag = cost[batch_idx, src_idx, jnp.arange(M)].reshape(-1, 1)
    cn = 1.0 - (cdiag - cdiag.min()) / (cdiag.max() - cdiag.min()) + 0.1
    sxy = jnp.clip(tp - anc + rm, 0.0, 2 * rm - 0.01)
    tl = jnp.floor(sxy).astype(jnp.int32)
    wl = (tl + 1).astype(jnp.float32) - sxy
    wr = 1.0 - wl
    logp_d = jax.nn.log_softmax(sd.reshape(M * 2, -1), axis=-1)
    ce_l = -jnp.take_along_axis(logp_d, tl.reshape(-1, 1), axis=-1).reshape(M, 2)
    ce_r = -jnp.take_along_axis(logp_d, (tl + 1).reshape(-1, 1), axis=-1).reshape(M, 2)
    dfl = jnp.mean(ce_l * wl + ce_r * wr, axis=-1, keepdims=True) * cn
    loss_points = dfl.sum() / cn.sum()
    return {'loss_ce': loss_ce, 'loss_points': loss_points}


# -----------------------------------------------------------------------------
if __name__ == "__main__":
    key = jax.random.PRNGKey(0)
    B, N = 2, 256                # batch, number of proposal/anchor points
    num_classes, reg_max = 1, 8
    K = num_classes + 1
    nb = 2 * reg_max + 1

    k1, k2, k3, k4, k5 = jax.random.split(key, 5)
    pred_logits = jax.random.normal(k1, (B, N, K), jnp.float32)
    pred_points = jax.random.uniform(k2, (B, N, 2), jnp.float32, minval=0.0, maxval=16.0)
    xs = jnp.arange(N, dtype=jnp.float32)
    anchor_points = jnp.tile(jnp.stack([xs, xs], axis=-1)[None], (B, 1, 1))   # [B,N,2]
    pred_dist_raw = jax.random.normal(k3, (B, nb, 2 * N), jnp.float32)        # [B, c, a]

    n_t = (3, 4)
    tgt_points = [jax.random.uniform(k4, (n_t[0], 2), jnp.float32, minval=0.0, maxval=16.0),
                  jax.random.uniform(k5, (n_t[1], 2), jnp.float32, minval=0.0, maxval=16.0)]
    targets = [{'labels': jnp.ones((n,), jnp.int32), 'point': p}
               for n, p in zip(n_t, tgt_points)]

    outputs = {'pred_logits': pred_logits,
               'pred_points': pred_points,
               'pred_dist': pred_dist_raw,
               'anchor_points': anchor_points}

    # max_lane_tile=128 at this small size exercises the multi-step row grid
    # (CE: 512 rows -> 4 grid steps); production default is 2048-row tiles.
    crit = SetCriterionCrowdPallas(
        num_classes=num_classes, matcher=simple_matcher,
        weight_dict={'loss_ce': 1.0, 'loss_points': 0.0002},
        eos_coef=0.5, reg_max=reg_max, losses=['labels', 'points'],
        max_lane_tile=128)

    losses = crit.forward(outputs, targets)
    losses = jax.block_until_ready(losses)

    ref = jax.block_until_ready(ref_forward(outputs, targets, crit))
    np.testing.assert_allclose(np.asarray(losses['loss_ce']),
                               np.asarray(ref['loss_ce']), rtol=2e-4, atol=2e-4)
    np.testing.assert_allclose(np.asarray(losses['loss_points']),
                               np.asarray(ref['loss_points']), rtol=2e-4, atol=2e-4)
    print("KERNEL_OK")
</pallas_src>

<mosaic_0001>
module attributes {stable_mosaic.version = 11 : i64} {
  func.func @_weighted_ce_kernel(%arg0: i32, %arg1: memref<2x128xf32, #tpu.memory_space<vmem>>, %arg2: memref<1x128xi32, #tpu.memory_space<vmem>>, %arg3: memref<1x128xf32, #tpu.memory_space<vmem>>, %arg4: memref<1x1xf32, #tpu.memory_space<vmem>>, %arg5: memref<1x1xf32, #tpu.memory_space<vmem>>, %arg6: memref<1x1xf32, #tpu.memory_space<vmem>>) attributes {dimension_semantics = [#tpu.dimension_semantics<arbitrary>], iteration_bounds = array<i64: 4>, scalar_prefetch = 0 : i64, scratch_operands = 2 : i64, tpu.core_type = #tpu.core_type<tc>, window_params = [{transform_indices = @transform_0, window_bounds = array<i64: 2, 128>}, {transform_indices = @transform_1, window_bounds = array<i64: 1, 128>}, {transform_indices = @transform_2, window_bounds = array<i64: 1, 128>}, {pipeline_mode = #tpu.pipeline_mode<synchronous>, transform_indices = @transform_3, window_bounds = array<i64: 1, 1>}]} {
    %c0_i32 = arith.constant 0 : i32
    %0 = arith.cmpi eq, %arg0, %c0_i32 : i32
    %1 = arith.extui %0 : i1 to i32
    %c0_i32_0 = arith.constant 0 : i32
    %2 = arith.cmpi ne, %1, %c0_i32_0 : i32
    scf.if %2 {
      %cst_19 = arith.constant 0.000000e+00 : f32
      %44 = vector.broadcast %cst_19 : f32 to vector<1x1xf32>
      %c0_20 = arith.constant 0 : index
      %c0_21 = arith.constant 0 : index
      %45 = vector.load %arg5[%c0_20, %c0_21] : memref<1x1xf32, #tpu.memory_space<vmem>>, vector<1x1xf32>
      tpu.vector_store %arg5[%c0_20, %c0_21], %44 {strides = array<i32>} : memref<1x1xf32, #tpu.memory_space<vmem>>, vector<1x1xf32>,
      %cst_22 = arith.constant 0.000000e+00 : f32
      %46 = vector.broadcast %cst_22 : f32 to vector<1x1xf32>
      %c0_23 = arith.constant 0 : index
      %c0_24 = arith.constant 0 : index
      %47 = vector.load %arg6[%c0_23, %c0_24] : memref<1x1xf32, #tpu.memory_space<vmem>>, vector<1x1xf32>
      tpu.vector_store %arg6[%c0_23, %c0_24], %46 {strides = array<i32>} : memref<1x1xf32, #tpu.memory_space<vmem>>, vector<1x1xf32>,
    } else {
    }
    %c0 = arith.constant 0 : index
    %c0_1 = arith.constant 0 : index
    %3 = vector.load %arg1[%c0, %c0_1] : memref<2x128xf32, #tpu.memory_space<vmem>>, vector<2x128xf32>
    %c0_2 = arith.constant 0 : index
    %c0_3 = arith.constant 0 : index
    %4 = vector.load %arg2[%c0_2, %c0_3] : memref<1x128xi32, #tpu.memory_space<vmem>>, vector<1x128xi32>
    %c0_4 = arith.constant 0 : index
    %c0_5 = arith.constant 0 : index
    %5 = vector.load %arg3[%c0_4, %c0_5] : memref<1x128xf32, #tpu.memory_space<vmem>>, vector<1x128xf32>
    %cst = arith.constant dense<0xFF800000> : vector<128xf32>
    %6 = vector.multi_reduction <maximumf>, %3, %cst [0] : vector<2x128xf32> to vector<128xf32>
    %7 = vector.shape_cast %6 : vector<128xf32> to vector<1x128xf32>
    %8 = vector.broadcast %7 : vector<1x128xf32> to vector<2x128xf32>
    %9 = arith.subf %3, %8 : vector<2x128xf32>
    %10 = math.exp %9 : vector<2x128xf32>
    %cst_6 = arith.constant dense<0.000000e+00> : vector<128xf32>
    %11 = vector.multi_reduction <add>, %10, %cst_6 [0] : vector<2x128xf32> to vector<128xf32>
    %12 = vector.shape_cast %11 : vector<128xf32> to vector<1x128xf32>
    %13 = math.log %12 : vector<1x128xf32>
    %14 = arith.addf %7, %13 : vector<1x128xf32>
    %15 = tpu.iota {dimensions = array<i32: 0>} : vector<2x128xi32>
    %16 = vector.broadcast %4 : vector<1x128xi32> to vector<2x128xi32>
    %17 = arith.cmpi eq, %15, %16 : vector<2x128xi32>
    %18 = arith.extui %17 : vector<2x128xi1> to vector<2x128xi32>
    %19 = arith.sitofp %18 : vector<2x128xi32> to vector<2x128xf32>
    %20 = arith.mulf %3, %19 : vector<2x128xf32>
    %cst_7 = arith.constant dense<0.000000e+00> : vector<128xf32>
    %21 = vector.multi_reduction <add>, %20, %cst_7 [0] : vector<2x128xf32> to vector<128xf32>
    %22 = vector.shape_cast %21 : vector<128xf32> to vector<1x128xf32>
    %23 = arith.subf %14, %22 : vector<1x128xf32>
    %24 = arith.mulf %23, %5 : vector<1x128xf32>
    %c0_8 = arith.constant 0 : index
    %c0_9 = arith.constant 0 : index
    %25 = vector.load %arg5[%c0_8, %c0_9] : memref<1x1xf32, #tpu.memory_space<vmem>>, vector<1x1xf32>
    %26 = vector.shape_cast %24 : vector<1x128xf32> to vector<1x1x128xf32>
    %cst_10 = arith.constant dense<0.000000e+00> : vector<1xf32>
    %27 = vector.multi_reduction <add>, %26, %cst_10 [1, 2] : vector<1x1x128xf32> to vector<1xf32>
    %28 = vector.shape_cast %27 : vector<1xf32> to vector<1x1x1xf32>
    %29 = vector.extract %28[0, 0, 0] : f32 from vector<1x1x1xf32>
    %30 = vector.broadcast %29 : f32 to vector<1x1xf32>
    %31 = arith.addf %25, %30 : vector<1x1xf32>
    %c0_11 = arith.constant 0 : index
    %c0_12 = arith.constant 0 : index
    %32 = vector.load %arg5[%c0_11, %c0_12] : memref<1x1xf32, #tpu.memory_space<vmem>>, vector<1x1xf32>
    tpu.vector_store %arg5[%c0_11, %c0_12], %31 {strides = array<i32>} : memref<1x1xf32, #tpu.memory_space<vmem>>, vector<1x1xf32>,
    %c0_13 = arith.constant 0 : index
    %c0_14 = arith.constant 0 : index
    %33 = vector.load %arg6[%c0_13, %c0_14] : memref<1x1xf32, #tpu.memory_space<vmem>>, vector<1x1xf32>
    %34 = vector.shape_cast %5 : vector<1x128xf32> to vector<1x1x128xf32>
    %cst_15 = arith.constant dense<0.000000e+00> : vector<1xf32>
    %35 = vector.multi_reduction <add>, %34, %cst_15 [1, 2] : vector<1x1x128xf32> to vector<1xf32>
    %36 = vector.shape_cast %35 : vector<1xf32> to vector<1x1x1xf32>
    %37 = vector.extract %36[0, 0, 0] : f32 from vector<1x1x1xf32>
    %38 = vector.broadcast %37 : f32 to vector<1x1xf32>
    %39 = arith.addf %33, %38 : vector<1x1xf32>
    %c0_16 = arith.constant 0 : index
    %c0_17 = arith.constant 0 : index
    %40 = vector.load %arg6[%c0_16, %c0_17] : memref<1x1xf32, #tpu.memory_space<vmem>>, vector<1x1xf32>
    tpu.vector_store %arg6[%c0_16, %c0_17], %39 {strides = array<i32>} : memref<1x1xf32, #tpu.memory_space<vmem>>, vector<1x1xf32>,
    %c3_i32 = arith.constant 3 : i32
    %41 = arith.cmpi eq, %arg0, %c3_i32 : i32
    %42 = arith.extui %41 : i1 to i32
    %c0_i32_18 = arith.constant 0 : i32
    %43 = arith.cmpi ne, %42, %c0_i32_18 : i32
    scf.if %43 {
      %c0_19 = arith.constant 0 : index
      %c0_20 = arith.constant 0 : index
      %44 = vector.load %arg5[%c0_19, %c0_20] : memref<1x1xf32, #tpu.memory_space<vmem>>, vector<1x1xf32>
      %c0_21 = arith.constant 0 : index
      %c0_22 = arith.constant 0 : index
      %45 = vector.load %arg6[%c0_21, %c0_22] : memref<1x1xf32, #tpu.memory_space<vmem>>, vector<1x1xf32>
      %46 = tpu.reciprocal %45 : vector<1x1xf32> -> vector<1x1xf32>
      %47 = arith.mulf %44, %46 : vector<1x1xf32>
      %c0_23 = arith.constant 0 : index
      %c0_24 = arith.constant 0 : index
      %48 = vector.load %arg4[%c0_23, %c0_24] : memref<1x1xf32, #tpu.memory_space<vmem>>, vector<1x1xf32>
      tpu.vector_store %arg4[%c0_23, %c0_24], %47 {strides = array<i32>} : memref<1x1xf32, #tpu.memory_space<vmem>>, vector<1x1xf32>,
    } else {
    }
    return
  }
  func.func @transform_0(%arg0: i32) -> (i32, i32) {
    %c0_i32 = arith.constant 0 : i32
    %c0_i32_0 = arith.constant 0 : i32
    return %c0_i32, %arg0 : i32, i32
  }
  func.func @transform_1(%arg0: i32) -> (i32, i32) {
    %c0_i32 = arith.constant 0 : i32
    %c0_i32_0 = arith.constant 0 : i32
    return %c0_i32, %arg0 : i32, i32
  }
  func.func @transform_2(%arg0: i32) -> (i32, i32) {
    %c0_i32 = arith.constant 0 : i32
    %c0_i32_0 = arith.constant 0 : i32
    return %c0_i32, %arg0 : i32, i32
  }
  func.func @transform_3(%arg0: i32) -> (i32, i32) {
    %c0_i32 = arith.constant 0 : i32
    %c0_i32_0 = arith.constant 0 : i32
    %c0_i32_1 = arith.constant 0 : i32
    return %c0_i32, %c0_i32_0 : i32, i32
  }
}

</mosaic_0001>

<bundles_post_ra>
// kernel: tpu_custom_call.1
= control target key start
LH: loop header
LB: loop body
LE: loop exit
PB: predicated region body
PF: predicated region fallthrough
CT: control target
= control target key end

     0   :  { %8 = vsyncpa [#allocation5], 0  ;;  %s858_s0 = inlined_call_operand.hbm [shape: f32[2,512], index: 0, kind: input, shape index: {}]   ;;  %s859_s1 = inlined_call_operand.hbm [shape: s32[1,512], index: 1, kind: input, shape index: {}]   ;;  %s860_s2 = inlined_call_operand.hbm [shape: f32[1,512], index: 2, kind: input, shape index: {}]   ;;  %s861_s3 = inlined_call_operand.hbm [shape: f32[1,1], index: 3, kind: output, shape index: {}]  }
   0x1   :  { %10 = vsyncpa [#allocation5 + $0x1], 0 }
   0x2   :  { %11 = vsyncpa [#allocation8], 0 }
   0x3   :  { %13 = vsyncpa [#allocation8 + $0x1], 0 }
   0x4   :  { %14 = vsyncpa [#allocation6], 0  ;;  %s704_s12 = smov 0   ;;  %s706_s13 = smov 0  }
   0x5   :  { %s708_s14 = smov 0   ;;  %s710_s15 = smov 0  }
   0x6 LB: > { %s723_s16 = sadd.s32 4294967295, %s679_s15   ;;  %s726_s17 = sadd.s32 1, %s679_s15   ;;  %s679_s15 = sphi %s710_s15, %s868_s15   ;;  %s675_s14 = sphi %s708_s14, %s867_s14   ;;  %s671_s13 = sphi %s706_s13, %s866_s13   ;;  %s667_s12 = sphi %s704_s12, %s865_s12  }
   0x7   : > { %s24_s18 = ssub.s32 %s679_s15, %s726_s17  ;;  %s27_s19 = sadd.s32 1, %s675_s14 }
   0x8   : > { %p25_p0 = scmp.eq.s32.totalorder %s24_s18, 0  ;;  %p34_p1 = scmp.ne.s32.totalorder %s675_s14, %s671_s13 }
   0x9   : > { %p35_p2 = scmp.eq.s32.totalorder %s679_s15, 0  ;;  %p40_p3 = scmp.ne.s32.totalorder %s671_s13, %s667_s12 }
   0xa   : > { %s736_s20 = scalar_select %p25_p0, %s675_s14, %s27_s19  }
   0xb   : > { %p36_p4 = por %p35_p2, %p34_p1  ;;  %p41_p5 = scmp.eq.s32.totalorder %s723_s16, 0 }
   0xc   : > { %p474_p6 = scmp.lt.s32.totalorder %s679_s15, 4  ;;  %s745_s22 = sand.u32 1, %s675_s14  }
   0xd   : > { %p740_p7 = por %p41_p5, %p40_p3  ;;  %s156_s24 = sand.u32 1, %s679_s15  }
   0xe   : > { %p747_p8 = pnand %p474_p6, %p36_p4  ;;  %s162_s27 = scalar_lea.hbm %s859_s1, %s679_s15 }
   0xf   : > { %s164_s28 = sshll.u32 %s162_s27, 4  ;;  %s159_s29 = scalar_lea.vmem [#allocation7], %s745_s22  ;;  %s165_s28 = int_to_ptr.hbm [resolvable:$true] %s164_s28 }
  0x10   : > { %s166_s30 = sshll.u32 %s159_s29, 4  ;;  %s757_s4 = scalar_lea.sflag [#allocation8], %s156_s24  ;;  %s167_s30 = int_to_ptr.vmem [resolvable:$true] %s166_s30 }
  0x11   : > { %s519_s5 = sshra.s32 %s165_s28, 4  ;;  %p523_p10 = pneg %p747_p8  ;;  %s520_s5 = int_to_ptr.hbm [resolvable:$true] %s519_s5 }
  0x12   : > { %s521_s6 = scalar_lea.hbm %s520_s5, 1  ;;  %s526_s9 = scalar_lea.hbm %s859_s1, 4 }
  0x13   : > { %p522_p9 = scmp.ne.s32.totalorder %s520_s5, %s521_s6  ;;  %p527_p13 = scmp.lt.s32.totalorder %s520_s5, %s859_s1 }
  0x14   : > { %p528_p0 = scmp.lt.s32.totalorder %s526_s9, %s521_s6 }
  0x15   : > { %p524_p11 = pnand %p523_p10, %p522_p9 }
  0x16   : > { %p529_p1 = por %p528_p0, %p527_p13 }
  0x17   : > { %p525_p12 = pneg %p524_p11 }
  0x19   : > { %p530_p2 = pnand %p529_p1, %p525_p12 }
  0x1b   : > { %533 = shalt.err (!%p530_p2)
}
  0x1c   : > { %470 = dma.hbm_to_vmem [thread:$0]  (!%p747_p8), %s165_s28, 16, %s167_s30, %s757_s4  }
  0x1d   : > { %p441_p3 = scmp.ge.s32.totalorder %s679_s15, 1  ;;  %p188_p4 = scmp.lt.s32.totalorder %s679_s15, 5 }
  0x1e   : > { %s439_s12 = sshll.u32 %s745_s22, 1  ;;  %s440_s19 = sshll.u32 %s679_s15, 1 }
  0x1f   : > { %p776_p5 = pnand %p441_p3, %p188_p4  ;;  %s141_s24 = scalar_lea.vmem [#allocation4], %s439_s12 }
  0x20   : > { %s149_s25 = sshll.u32 %s141_s24, 4  ;;  %s145_s29 = scalar_lea.hbm %s858_s0, %s440_s19  ;;  %s150_s25 = int_to_ptr.vmem [resolvable:$true] %s149_s25 }
  0x21   : > { %s147_s5 = sshll.u32 %s145_s29, 4  ;;  %s179_s30 = scalar_lea.hbm %s860_s2, %s679_s15  ;;  %s148_s5 = int_to_ptr.hbm [resolvable:$true] %s147_s5 }
  0x22   : > { %s138_s7 = scalar_lea.sflag [#allocation5], %s745_s22  ;;  %s549_s8 = sshra.s32 %s148_s5, 4  ;;  %s550_s8 = int_to_ptr.hbm [resolvable:$true] %s549_s8 }
  0x23   : > { %s551_s9 = scalar_lea.hbm %s550_s8, 2  ;;  %s556_s12 = scalar_lea.hbm %s858_s0, 8 }
  0x24   : > { %p552_p6 = scmp.ne.s32.totalorder %s550_s8, %s551_s9  ;;  %p557_p12 = scmp.lt.s32.totalorder %s550_s8, %s858_s0 }
  0x25   : > { %p558_p13 = scmp.lt.s32.totalorder %s556_s12, %s551_s9 }
  0x26   : > { %p554_p9 = pnand %p552_p6, %p523_p10 }
  0x27   : > { %p559_p0 = por %p558_p13, %p557_p12 }
  0x28   : > { %p555_p11 = pneg %p554_p9 }
  0x2a   : > { %p560_p1 = pnand %p559_p0, %p555_p11 }
  0x2c   : > { %563 = shalt.err (!%p560_p1)
}
  0x2d   : > { %467 = dma.hbm_to_vmem [thread:$0]  (!%p747_p8), %s148_s5, 32, %s150_s25, %s138_s7  }
  0x2e   : > { %s181_s15 = sshll.u32 %s179_s30, 4  ;;  %s176_s26 = scalar_lea.vmem [#allocation9], %s745_s22  ;;  %s182_s15 = int_to_ptr.hbm [resolvable:$true] %s181_s15 }
  0x2f   : > { %s183_s27 = sshll.u32 %s176_s26, 4  ;;  %s579_s29 = sshra.s32 %s182_s15, 4  ;;  %s184_s27 = int_to_ptr.vmem [resolvable:$true] %s183_s27  ;;  %s580_s29 = int_to_ptr.hbm [resolvable:$true] %s579_s29 }
  0x30   : > { %s581_s6 = scalar_lea.hbm %s580_s29, 1  ;;  %s586_s9 = scalar_lea.hbm %s860_s2, 4 }
  0x31   : > { %p582_p2 = scmp.ne.s32.totalorder %s580_s29, %s581_s6  ;;  %p587_p6 = scmp.lt.s32.totalorder %s580_s29, %s860_s2 }
  0x32   : > { %p588_p9 = scmp.lt.s32.totalorder %s586_s9, %s581_s6 }
  0x33   : > { %p584_p3 = pnand %p582_p2, %p523_p10 }
  0x34   : > { %p589_p11 = por %p588_p9, %p587_p6 }
  0x35   : > { %p585_p4 = pneg %p584_p3 }
  0x37   : > { %p590_p12 = pnand %p589_p11, %p585_p4 }
  0x39   : > { %593 = shalt.err (!%p590_p12)
}
  0x3a   : > { %473 = dma.hbm_to_vmem [thread:$0]  (!%p747_p8), %s182_s15, 16, %s184_s27, %s757_s4  }
  0x3b   : > { %192 = sbr.rel (%p776_p5) target bundleno = 354 (0x162), region = 32  ;;  %s816_s22 = sand.u32 (!%p776_p5), 1, %s671_s13  }
  0x3c   : > { %s442_s25 = sshll.u32 (!%p776_p5), %s816_s22, 1  ;;  %s195_s5 = scalar_lea.sflag (!%p776_p5), [#allocation5], %s816_s22 }
  0x3d   : > { %s198_s30 = scalar_lea.vmem (!%p776_p5), [#allocation4], %s442_s25 }
  0x40   : > { %654 = dma.done.wait (%p740_p7), %s195_s5, 32  }
  0x41   : > { %656 = vsyncadd (%p740_p7), %s195_s5, 4294967264  ;;  %s204_s23 = sand.u32 1, %s723_s16   ;;  %s207_s18 = scalar_lea.vmem [#allocation7], %s816_s22 }
  0x42   : > { %s205_s4 = scalar_lea.sflag [#allocation8], %s204_s23 }
  0x43   : > { %658 = dma.done.wait (%p740_p7), %s205_s4, 32  }
  0x44   : > { %660 = vsyncadd (%p740_p7), %s205_s4, 4294967264  ;;  %s216_s7 = scalar_lea.vmem [#allocation9], %s816_s22  ;;  %p443_p8 = scmp.ne.s32.totalorder %s723_s16, 0 }
  0x46   : > { %246 = sbr.rel (%p443_p8) target bundleno = 78 (0x4e), region = 48 }
  0x4b   : > { %vm247_vm0 = vcmask 0   ;;  %v681_v0 = vmov 0.0  }
  0x4c   : > { %248 = vst.msk [vmem:[#allocation2] sm:$0x1] %vm247_vm0, %v681_v0 }
  0x4d   : > { %249 = vst.msk [vmem:[#allocation3] sm:$0x1] %vm247_vm0, %v681_v0 }
  0x4e PF: > { %v250_v1 = vld [vmem:[%s198_s30] sm:$0x3]  ;;  %vm253_vm1 = vcmask 1041408   ;;  %v274_v5 = vlaneseq  ;;  %v512_v9 = vld [vmem:[%s207_s18] ss:$0 sm:$0xff]  ;;  %v682_v13 = vmov 0.0  }
  0x4f   : > { %v254_v2 = vsel %vm253_vm1, %v250_v1, -inf  ;;  %v252_v35 = vld [vmem:[%s216_s7] sm:$0x1]  ;;  %vm291_vm3 = vcmask 1040384   ;;  %vm304_vm4 = vcmask 0   ;;  %p445_p7 = scmp.ne.s32.totalorder %s723_s16, 3 }
  0x50   : > { %v255_v3 = vrot.slane %v254_v2, 4  ;;  %v275_v8 = vshrl.u32 %v274_v5, 7  ;;  %v307_v39 = vsel %vm291_vm3, %v252_v35, 0.0 }
  0x52   : > { %v256_v4 = vmax.f32 %v254_v2, %v255_v3  ;;  %vm277_vm2 = vcmp.eq.s32.totalorder %v275_v8, %v512_v9 }
  0x53   : > { %v444_v14 = vsel %vm277_vm2, 1.0, %v682_v13  ;;  %v290_v54 = vld [vmem:[#allocation2] sm:$0x1] }
  0x54   : > { %v257_v6 = vrot.slane %v256_v4, 2  ;;  %v280_v16 = vmul.f32 %v444_v14, %v250_v1  ;;  %v306_v57 = vld [vmem:[#allocation3] sm:$0x1] }
  0x56   : > { %v258_v7 = vmax.f32 %v256_v4, %v257_v6  ;;  %v281_v17 = vsel %vm253_vm1, %v280_v16, 0.0 }
  0x57   : > { %v282_v20 = vrot.slane %v281_v17, 4 }
  0x58   : > { %v259_v10 = vrot.slane %v258_v7, 1 }
  0x59   : > { %v283_v23 = vadd.f32 %v282_v20, %v281_v17 }
  0x5a   : > { %v260_v11 = vmax.f32 %v258_v7, %v259_v10 }
  0x5b   : > { %v284_v26 = vrot.slane %v283_v23, 2 }
  0x5c   : > { %v261_v12 = vsub.f32 %v250_v1, %v260_v11 }
  0x5d   : > { %v285_v29 = vadd.f32 %v284_v26, %v283_v23 }
  0x5e   : > { %v262_v15 = vmul.f32 1.442695, %v261_v12 }
  0x5f   : > { %v286_v30 = vrot.slane %v285_v29, 1 }
  0x60   : > { %513 = vpow2.f32 %v262_v15 }
  0x61   : > { %v287_v33 = vadd.f32 %v286_v30, %v285_v29 }
  0x66   : > { %v514_v18 = vpop.eup %513 }
  0x67   : > { %v264_v19 = vsel %vm253_vm1, %v514_v18, 0.0 }
  0x68   : > { %v265_v21 = vrot.slane %v264_v19, 4 }
  0x6a   : > { %v266_v22 = vadd.f32 %v265_v21, %v264_v19 }
  0x6c   : > { %v267_v24 = vrot.slane %v266_v22, 2 }
  0x6e   : > { %v268_v25 = vadd.f32 %v267_v24, %v266_v22 }
  0x70   : > { %v269_v27 = vrot.slane %v268_v25, 1 }
  0x72   : > { %v270_v28 = vadd.f32 %v269_v27, %v268_v25 }
  0x74   : > { %515 = vlog2.f32 %v270_v28 }
  0x7a   : > { %v516_v31 = vpop.eup %515 }
  0x7b   : > { %v272_v32 = vmul.f32 0.6931472, %v516_v31 }
  0x7d   : > { %v273_v34 = vadd.f32 %v272_v32, %v260_v11 }
  0x7f   : > { %v288_v36 = vsub.f32 %v273_v34, %v287_v33 }
  0x81   : > { %v289_v37 = vmul.f32 %v288_v36, %v252_v35 }
  0x83   : > { %v292_v38 = vsel %vm291_vm3, %v289_v37, 0.0 }
  0x84   : > { %293 = vadd.xlane.f32.xlu0 %v292_v38 }
  0x8c   : > { %308 = vadd.xlane.f32.xlu0 %v307_v39 }
  0xf7   : > { %v294_v40 = vpop.xlane.xlu0 %293 }
  0xf8   : > { %v295_v41 = vrot.slane %v294_v40, 4 }
  0xfa   : > { %v296_v42 = vadd.f32 %v295_v41, %v294_v40 }
  0xfc   : > { %v297_v43 = vrot.slane %v296_v42, 2 }
  0xfe   : > { %v298_v44 = vadd.f32 %v297_v43, %v296_v42 }
  0xff   : > { %v309_v45 = vpop.xlane.xlu0 %308 }
 0x100   : > { %v310_v46 = vrot.slane %v309_v45, 4  ;;  %v299_v47 = vrot.slane %v298_v44, 1 }
 0x102   : > { %v311_v48 = vadd.f32 %v310_v46, %v309_v45  ;;  %v300_v49 = vadd.f32 %v299_v47, %v298_v44 }
 0x104   : > { %v312_v50 = vrot.slane %v311_v48, 2  ;;  %450 = vpush %v300_v49 }
 0x106   : > { %v313_v51 = vadd.f32 %v312_v50, %v311_v48 }
 0x108   : > { %v314_v52 = vrot.slane %v313_v51, 1 }
 0x10a   : > { %v315_v53 = vadd.f32 %v314_v52, %v313_v51 }
 0x10c   : > { %452 = vpush %v315_v53 }
 0x135   : > { %s451_s21 = spop %450 }
 0x136   : > { %v302_v55 = vstv %s451_s21 }
 0x137   : > { %v303_v56 = vadd.f32 %v302_v55, %v290_v54 }
 0x139   : > { %305 = vst.msk [vmem:[#allocation2] sm:$0x1] %vm304_vm4, %v303_v56 }
 0x13d   : > { %s453_s12 = spop %452  ;;  %323 = sbr.rel (%p445_p7) target bundleno = 349 (0x15d), region = 52 }
 0x13e   : > { %v317_v58 = vstv %s453_s12 }
 0x13f   : > { %v318_v59 = vadd.f32 %v317_v58, %v306_v57 }
 0x141   : > { %319 = vst.msk [vmem:[#allocation3] sm:$0x1] %vm304_vm4, %v318_v59 }
 0x142   : > { %v324_v5 = vld [vmem:[#allocation2] sm:$0x1] }
 0x148   : > { %v325_v60 = vld [vmem:[#allocation3] sm:$0x1] }
 0x149   : > { %517 = vrcp.f32 %v325_v60  ;;  %v337_v63 = vand.u32 2147483648, %v325_v60  ;;  %vm331_vm5 = vweird.f32 %v325_v60  ;;  %v335_v1 = vand.u32 2147483647, %v325_v60 }
 0x14b   : > { %v338_v3 = vor.u32 1.1754944e-38, %v337_v63  ;;  %vm336_vm8 = vcmp.eq.f32.partialorder %v335_v1, 8.507059e+37 }
 0x14f   : > { %v518_v61 = vpop.eup %517 }
 0x150   : > { %v327_v62 = vmul.f32 %v518_v61, %v325_v60  ;;  %vm332_vm6 = vweird.f32 %v518_v61 }
 0x151   : > { %vm333_vm7 = vmor %vm331_vm5, %vm332_vm6 }
 0x152   : > { %v328_v0 = vsub.f32 1.0, %v327_v62 }
 0x154   : > { %v329_v2 = vmul.f32 %v518_v61, %v328_v0 }
 0x156   : > { %v330_v4 = vadd.f32 %v518_v61, %v329_v2 }
 0x158   : > { %v334_v6 = vsel %vm333_vm7, %v518_v61, %v330_v4 }
 0x159   : > { %v339_v7 = vsel %vm336_vm8, %v338_v3, %v334_v6 }
 0x15a   : > { %v340_v8 = vmul.f32 %v339_v7, %v324_v5 }
 0x15c   : > { %341 = vst.msk [vmem:[#allocation10] sm:$0x1] %vm304_vm4, %v340_v8 }
 0x15d PF: > { %p475_p10 = scmp.eq.s32.totalorder %s723_s16, 3  ;;  %s683_s19 = smov [#allocation10]  }
 0x15e   : > { %s348_s24 = sshll.u32 %s683_s19, 4  ;;  %s350_s27 = sshll.u32 %s861_s3, 4  ;;  %s349_s24 = int_to_ptr.vmem [resolvable:$true] %s348_s24  ;;  %s351_s27 = int_to_ptr.hbm [resolvable:$true] %s350_s27 }
 0x15f   : > { %461 = dma.vmem_to_hbm [thread:$0]  (%p475_p10), %s349_s24, 16, %s351_s27, [#allocation6]  }
 0x160   : > { %662 = dma.done.wait (%p475_p10), [#allocation6], 16  }
 0x161   : > { %664 = vsyncadd (%p475_p10), [#allocation6], 4294967280 }
 0x162 PF: > { %p17_p5 = scmp.ge.s32.totalorder %s726_s17, 6   ;;  %s865_s12 = smov %s671_s13 }
 0x163   : > { %s866_s13 = smov %s675_s14  ;;  %s867_s14 = smov %s736_s20 }
 0x164   : > { %s868_s15 = smov %s726_s17  ;;  %19 = sbr.rel (!%p17_p5) target bundleno = 6 (0x6), region = 101 }
 0x169   :  { %364 = vsyncpa [#allocation5], 1 }
 0x16a   :  { %366 = vsyncpa [#allocation5 + $0x1], 1 }
 0x16b   :  { %367 = vsyncpa [#allocation8], 1 }
 0x16c   :  { %369 = vsyncpa [#allocation8 + $0x1], 1 }
 0x16d   :  { %370 = vsyncpa [#allocation6], 1 }
 0x16e   :  { %372 = vsyncpa [#allocation6 + $0x1], 1 }

</bundles_post_ra>
